<compile_context>
chip_gen: v7x
topology: tpu7x:2x2x1
jax: 0.10.0
libtpu: 0.0.40
codegen_flags: <defaults>
</compile_context>

<pallas_src>
import functools

import jax
import jax.numpy as jnp
from jax.experimental import pallas as pl
from jax.experimental.pallas import tpu as pltpu


# ----------------------------------------------------------------------------
# Fused kernel: per-channel normalization  out = x * inv_std[c] + bias[c]
#               + padding-mask construction (1 = padding, 0 = valid)
# Grid: (image, row-tile).  Blocks: image/out (1, C, tile_h, W), mask (1, tile_h, W).
# ----------------------------------------------------------------------------
def _preprocess_kernel(inv_std_ref, bias_ref, sizes_ref, img_ref,
                       out_ref, mask_ref, *, tile_h):
    n = pl.program_id(0)   # image index
    t = pl.program_id(1)   # row-tile index

    # --- normalization: (x - mean) / std  ==  x * inv_std + (-mean * inv_std)
    # Static unroll over the tiny channel axis; each channel slab is a fully
    # dense (tile_h, W) sublane x lane tile -> unmasked vmul/vadd/vst per vreg.
    num_ch = out_ref.shape[1]
    for c in range(num_ch):
        out_ref[:, c:c + 1, :, :] = (
            img_ref[:, c:c + 1, :, :] * inv_std_ref[c] + bias_ref[c])

    # --- padding mask: 1 outside the valid (h, w) region of this image.
    # Row/col iotas directly on the (tile_h, W) block -> no per-element // or %.
    h = sizes_ref[2 * n]
    w = sizes_ref[2 * n + 1]
    rows = jax.lax.broadcasted_iota(jnp.int32, mask_ref.shape, 1) + t * tile_h
    cols = jax.lax.broadcasted_iota(jnp.int32, mask_ref.shape, 2)
    mask_ref[...] = ((rows >= h) | (cols >= w)).astype(jnp.int8)


def preprocess_images(images, pixel_mean, pixel_std, image_sizes):
    """Fused normalize + padding-mask (the `preprocess_image` path of Dino).

    Returns:
      normed : (N, C, H, W) float32, (x - mean) / std
      mask   : (N, H, W) bool, True (1) where padded, False (0) where valid
    """
    N, C, H, W = images.shape
    if images.dtype != jnp.float32:
        images = images.astype(jnp.float32)

    # Precompute multiply/add coefficients in the wrapper (no vdiv in-kernel).
    inv_std = 1.0 / pixel_std.reshape(-1).astype(jnp.float32)
    bias = (-pixel_mean.reshape(-1).astype(jnp.float32)) * inv_std
    sizes_flat = image_sizes.astype(jnp.int32).reshape(-1)      # (2N,), 1-D SMEM

    # Row tile: multiple of 8 sublanes (or full H); sized so double-buffered
    # in+out blocks stay well under the smallest scoped-VMEM budgets
    # (v5e 16 MiB default, v7x 64 MiB physical).  ~2 MiB f32 per block is safe.
    max_block_bytes = 2 * 1024 * 1024
    if C * H * W * 4 <= max_block_bytes:
        tile_h = H                                   # full dim — always legal
    else:
        tile_h = min(H, max(8, (max_block_bytes // (C * W * 4 * 8)) * 8))
    num_tiles = pl.cdiv(H, tile_h)

    kernel = functools.partial(_preprocess_kernel, tile_h=tile_h)
    normed, mask_i8 = pl.pallas_call(
        kernel,
        grid=(N, num_tiles),
        in_specs=[
            pl.BlockSpec(memory_space=pltpu.MemorySpace.SMEM),   # inv_std (C,)
            pl.BlockSpec(memory_space=pltpu.MemorySpace.SMEM),   # bias    (C,)
            pl.BlockSpec(memory_space=pltpu.MemorySpace.SMEM),   # sizes  (2N,)
            pl.BlockSpec((1, C, tile_h, W), lambda n, t: (n, 0, t, 0)),
        ],
        out_specs=[
            pl.BlockSpec((1, C, tile_h, W), lambda n, t: (n, 0, t, 0)),
            pl.BlockSpec((1, tile_h, W), lambda n, t: (n, t, 0)),
        ],
        out_shape=[
            jax.ShapeDtypeStruct((N, C, H, W), jnp.float32),
            jax.ShapeDtypeStruct((N, H, W), jnp.int8),
        ],
        compiler_params=pltpu.CompilerParams(
            dimension_semantics=("parallel", "parallel")),
    )(inv_std, bias, sizes_flat, images)

    # torch.bool mask convention (1 = padding).
    return normed, mask_i8.astype(jnp.bool_)


# ----------------------------------------------------------------------------
# Inference post-processing (Dino.inference): top-k decode, gather, box
# cxcywh -> xyxy + scale.  Tiny tensors — plain jnp so XLA fuses everything;
# a Pallas launch here would cost more than the work it does.
# ----------------------------------------------------------------------------
def dino_postprocess(pred_logits, pred_boxes, image_sizes, num_select):
    B, Q, K = pred_logits.shape

    # sigmoid is monotone -> top_k on raw logits selects the same entries;
    # only the selected values get the sigmoid (skips a B*Q*K EUP + HBM pass).
    topk_logits, topk_indexes = jax.lax.top_k(
        pred_logits.reshape(B, Q * K), num_select)
    scores = jax.nn.sigmoid(topk_logits)
    topk_boxes = topk_indexes // K
    labels = topk_indexes % K

    boxes = jnp.take_along_axis(
        pred_boxes,
        jnp.broadcast_to(topk_boxes[:, :, None], (B, num_select, 4)),
        axis=1,
    )

    # box_cxcywh_to_xyxy + Boxes.scale(scale_x=image_w, scale_y=image_h)
    cx, cy, bw, bh = boxes[..., 0], boxes[..., 1], boxes[..., 2], boxes[..., 3]
    hf = image_sizes[:, 0:1].astype(jnp.float32)   # height scales y
    wf = image_sizes[:, 1:2].astype(jnp.float32)   # width scales x
    x1 = (cx - 0.5 * bw) * wf
    y1 = (cy - 0.5 * bh) * hf
    x2 = (cx + 0.5 * bw) * wf
    y2 = (cy + 0.5 * bh) * hf
    boxes_xyxy = jnp.stack([x1, y1, x2, y2], axis=-1)
    return scores, labels, boxes_xyxy


# ----------------------------------------------------------------------------
# Forward wrapper (inference path of Dino.forward)
# ----------------------------------------------------------------------------
@functools.partial(jax.jit, static_argnames=("num_select",))
def dino_inference(images, image_sizes, pixel_mean, pixel_std,
                   pred_logits, pred_boxes, *, num_select):
    # preprocess_image: normalize + padding mask (NestedTensor equivalent)
    normed, mask = preprocess_images(images, pixel_mean, pixel_std, image_sizes)

    # TODO(synk): self.model = build_dino(args) transformer would consume
    # (normed, mask) here; pred_logits / pred_boxes stand in for its output.

    scores, labels, pred_boxes_xyxy = dino_postprocess(
        pred_logits, pred_boxes, image_sizes, num_select)

    return {
        "normalized_images": normed,
        "padding_mask": mask,
        "scores": scores,
        "pred_classes": labels,
        "pred_boxes": pred_boxes_xyxy,
    }


if __name__ == "__main__":
    key = jax.random.PRNGKey(0)
    k_img, k_logits, k_boxes = jax.random.split(key, 3)

    # Small shapes consistent with the module: RGB images (lane-aligned W),
    # DETR-style prediction heads.
    N, C, H, W = 2, 3, 32, 128
    Q, K, num_select = 32, 8, 8

    images = jax.random.uniform(k_img, (N, C, H, W), jnp.float32) * 255.0
    # per-image valid sizes (h, w); second image is "padded"
    image_sizes = jnp.array([[32, 128], [24, 100]], dtype=jnp.int32)

    # cfg.MODEL.PIXEL_MEAN / PIXEL_STD (ImageNet-like)
    pixel_mean = jnp.array([123.675, 116.28, 103.53], dtype=jnp.float32)
    pixel_std = jnp.array([58.395, 57.12, 57.375], dtype=jnp.float32)

    # Synthetic stand-in for the DINO transformer outputs (see TODO above).
    pred_logits = jax.random.normal(k_logits, (N, Q, K), jnp.float32)
    pred_boxes = jax.random.uniform(k_boxes, (N, Q, 4), jnp.float32)

    out = dino_inference(images, image_sizes, pixel_mean, pixel_std,
                         pred_logits, pred_boxes, num_select=num_select)
    jax.block_until_ready(out)

    # Lightweight correctness checks against a pure-jnp reference.
    ref_norm = (images - pixel_mean[None, :, None, None]) / pixel_std[None, :, None, None]
    assert jnp.allclose(out["normalized_images"], ref_norm, rtol=1e-4, atol=1e-4)
    rows = jnp.arange(H)[None, :, None]
    cols = jnp.arange(W)[None, None, :]
    ref_mask = (rows >= image_sizes[:, 0][:, None, None]) | \
               (cols >= image_sizes[:, 1][:, None, None])
    assert jnp.array_equal(out["padding_mask"], ref_mask)

    print("KERNEL_OK")
</pallas_src>

<mosaic_0001>
module attributes {stable_mosaic.version = 11 : i64} {
  func.func @_preprocess_kernel(%arg0: i32, %arg1: i32, %arg2: memref<3xf32, #tpu.memory_space<smem>>, %arg3: memref<3xf32, #tpu.memory_space<smem>>, %arg4: memref<4xi32, #tpu.memory_space<smem>>, %arg5: memref<1x3x32x128xf32, #tpu.memory_space<vmem>>, %arg6: memref<1x3x32x128xf32, #tpu.memory_space<vmem>>, %arg7: memref<1x32x128xi8, #tpu.memory_space<vmem>>) attributes {dimension_semantics = [#tpu.dimension_semantics<parallel>, #tpu.dimension_semantics<parallel>], iteration_bounds = array<i64: 2, 1>, scalar_prefetch = 0 : i64, scratch_operands = 0 : i64, tpu.core_type = #tpu.core_type<tc>, window_params = [{transform_indices = @transform_0, window_bounds = array<i64: 3>}, {transform_indices = @transform_1, window_bounds = array<i64: 3>}, {transform_indices = @transform_2, window_bounds = array<i64: 4>}, {transform_indices = @transform_3, window_bounds = array<i64: 1, 3, 32, 128>}, {transform_indices = @transform_4, window_bounds = array<i64: 1, 3, 32, 128>}, {transform_indices = @transform_5, window_bounds = array<i64: 1, 32, 128>}]} {
    %c0 = arith.constant 0 : index
    %c0_0 = arith.constant 0 : index
    %c0_1 = arith.constant 0 : index
    %c0_2 = arith.constant 0 : index
    %0 = vector.load %arg5[%c0, %c0_0, %c0_1, %c0_2] : memref<1x3x32x128xf32, #tpu.memory_space<vmem>>, vector<1x1x32x128xf32>
    %c0_3 = arith.constant 0 : index
    %1 = memref.load %arg2[%c0_3] : memref<3xf32, #tpu.memory_space<smem>>
    %2 = vector.broadcast %1 : f32 to vector<1x1x32x128xf32>
    %3 = arith.mulf %0, %2 : vector<1x1x32x128xf32>
    %c0_4 = arith.constant 0 : index
    %4 = memref.load %arg3[%c0_4] : memref<3xf32, #tpu.memory_space<smem>>
    %5 = vector.broadcast %4 : f32 to vector<1x1x32x128xf32>
    %6 = arith.addf %3, %5 : vector<1x1x32x128xf32>
    %c0_5 = arith.constant 0 : index
    %c0_6 = arith.constant 0 : index
    %c0_7 = arith.constant 0 : index
    %c0_8 = arith.constant 0 : index
    %7 = vector.load %arg6[%c0_5, %c0_6, %c0_7, %c0_8] : memref<1x3x32x128xf32, #tpu.memory_space<vmem>>, vector<1x1x32x128xf32>
    tpu.vector_store %arg6[%c0_5, %c0_6, %c0_7, %c0_8], %6 {strides = array<i32>} : memref<1x3x32x128xf32, #tpu.memory_space<vmem>>, vector<1x1x32x128xf32>,
    %c0_9 = arith.constant 0 : index
    %c1 = arith.constant 1 : index
    %c0_10 = arith.constant 0 : index
    %c0_11 = arith.constant 0 : index
    %8 = vector.load %arg5[%c0_9, %c1, %c0_10, %c0_11] : memref<1x3x32x128xf32, #tpu.memory_space<vmem>>, vector<1x1x32x128xf32>
    %c1_12 = arith.constant 1 : index
    %9 = memref.load %arg2[%c1_12] : memref<3xf32, #tpu.memory_space<smem>>
    %10 = vector.broadcast %9 : f32 to vector<1x1x32x128xf32>
    %11 = arith.mulf %8, %10 : vector<1x1x32x128xf32>
    %c1_13 = arith.constant 1 : index
    %12 = memref.load %arg3[%c1_13] : memref<3xf32, #tpu.memory_space<smem>>
    %13 = vector.broadcast %12 : f32 to vector<1x1x32x128xf32>
    %14 = arith.addf %11, %13 : vector<1x1x32x128xf32>
    %c0_14 = arith.constant 0 : index
    %c1_15 = arith.constant 1 : index
    %c0_16 = arith.constant 0 : index
    %c0_17 = arith.constant 0 : index
    %15 = vector.load %arg6[%c0_14, %c1_15, %c0_16, %c0_17] : memref<1x3x32x128xf32, #tpu.memory_space<vmem>>, vector<1x1x32x128xf32>
    tpu.vector_store %arg6[%c0_14, %c1_15, %c0_16, %c0_17], %14 {strides = array<i32>} : memref<1x3x32x128xf32, #tpu.memory_space<vmem>>, vector<1x1x32x128xf32>,
    %c0_18 = arith.constant 0 : index
    %c2 = arith.constant 2 : index
    %c0_19 = arith.constant 0 : index
    %c0_20 = arith.constant 0 : index
    %16 = vector.load %arg5[%c0_18, %c2, %c0_19, %c0_20] : memref<1x3x32x128xf32, #tpu.memory_space<vmem>>, vector<1x1x32x128xf32>
    %c2_21 = arith.constant 2 : index
    %17 = memref.load %arg2[%c2_21] : memref<3xf32, #tpu.memory_space<smem>>
    %18 = vector.broadcast %17 : f32 to vector<1x1x32x128xf32>
    %19 = arith.mulf %16, %18 : vector<1x1x32x128xf32>
    %c2_22 = arith.constant 2 : index
    %20 = memref.load %arg3[%c2_22] : memref<3xf32, #tpu.memory_space<smem>>
    %21 = vector.broadcast %20 : f32 to vector<1x1x32x128xf32>
    %22 = arith.addf %19, %21 : vector<1x1x32x128xf32>
    %c0_23 = arith.constant 0 : index
    %c2_24 = arith.constant 2 : index
    %c0_25 = arith.constant 0 : index
    %c0_26 = arith.constant 0 : index
    %23 = vector.load %arg6[%c0_23, %c2_24, %c0_25, %c0_26] : memref<1x3x32x128xf32, #tpu.memory_space<vmem>>, vector<1x1x32x128xf32>
    tpu.vector_store %arg6[%c0_23, %c2_24, %c0_25, %c0_26], %22 {strides = array<i32>} : memref<1x3x32x128xf32, #tpu.memory_space<vmem>>, vector<1x1x32x128xf32>,
    %c2_i32 = arith.constant 2 : i32
    %24 = arith.muli %c2_i32, %arg0 : i32
    %25 = arith.index_cast %24 : i32 to index
    %26 = memref.load %arg4[%25] : memref<4xi32, #tpu.memory_space<smem>>
    %c2_i32_27 = arith.constant 2 : i32
    %27 = arith.muli %c2_i32_27, %arg0 : i32
    %c1_i32 = arith.constant 1 : i32
    %28 = arith.addi %27, %c1_i32 : i32
    %29 = arith.index_cast %28 : i32 to index
    %30 = memref.load %arg4[%29] : memref<4xi32, #tpu.memory_space<smem>>
    %31 = tpu.iota {dimensions = array<i32: 1>} : vector<1x32x128xi32>
    %c32_i32 = arith.constant 32 : i32
    %32 = arith.muli %arg1, %c32_i32 : i32
    %33 = vector.broadcast %32 : i32 to vector<1x32x128xi32>
    %34 = arith.addi %31, %33 : vector<1x32x128xi32>
    %35 = tpu.iota {dimensions = array<i32: 2>} : vector<1x32x128xi32>
    %36 = vector.broadcast %26 : i32 to vector<1x32x128xi32>
    %37 = arith.cmpi sge, %34, %36 : vector<1x32x128xi32>
    %38 = vector.broadcast %30 : i32 to vector<1x32x128xi32>
    %39 = arith.cmpi sge, %35, %38 : vector<1x32x128xi32>
    %40 = arith.ori %37, %39 : vector<1x32x128xi1>
    %41 = arith.extui %40 : vector<1x32x128xi1> to vector<1x32x128xi8>
    %c0_28 = arith.constant 0 : index
    %c0_29 = arith.constant 0 : index
    %c0_30 = arith.constant 0 : index
    %42 = vector.load %arg7[%c0_28, %c0_29, %c0_30] : memref<1x32x128xi8, #tpu.memory_space<vmem>>, vector<1x32x128xi8>
    tpu.vector_store %arg7[%c0_28, %c0_29, %c0_30], %41 {strides = array<i32>} : memref<1x32x128xi8, #tpu.memory_space<vmem>>, vector<1x32x128xi8>,
    return
  }
  func.func @transform_0(%arg0: i32, %arg1: i32) -> i32 {
    %c0_i32 = arith.constant 0 : i32
    %c0_i32_0 = arith.constant 0 : i32
    return %c0_i32 : i32
  }
  func.func @transform_1(%arg0: i32, %arg1: i32) -> i32 {
    %c0_i32 = arith.constant 0 : i32
    %c0_i32_0 = arith.constant 0 : i32
    return %c0_i32 : i32
  }
  func.func @transform_2(%arg0: i32, %arg1: i32) -> i32 {
    %c0_i32 = arith.constant 0 : i32
    %c0_i32_0 = arith.constant 0 : i32
    return %c0_i32 : i32
  }
  func.func @transform_3(%arg0: i32, %arg1: i32) -> (i32, i32, i32, i32) {
    %c0_i32 = arith.constant 0 : i32
    %c0_i32_0 = arith.constant 0 : i32
    %c0_i32_1 = arith.constant 0 : i32
    return %arg0, %c0_i32, %arg1, %c0_i32_0 : i32, i32, i32, i32
  }
  func.func @transform_4(%arg0: i32, %arg1: i32) -> (i32, i32, i32, i32) {
    %c0_i32 = arith.constant 0 : i32
    %c0_i32_0 = arith.constant 0 : i32
    %c0_i32_1 = arith.constant 0 : i32
    return %arg0, %c0_i32, %arg1, %c0_i32_0 : i32, i32, i32, i32
  }
  func.func @transform_5(%arg0: i32, %arg1: i32) -> (i32, i32, i32) {
    %c0_i32 = arith.constant 0 : i32
    %c0_i32_0 = arith.constant 0 : i32
    return %arg0, %arg1, %c0_i32 : i32, i32, i32
  }
}

</mosaic_0001>

<bundles_post_ra>
// kernel: dino_inference.1
= control target key start
LH: loop header
LB: loop body
LE: loop exit
PB: predicated region body
PF: predicated region fallthrough
CT: control target
= control target key end

     0   :  { %11 = vsyncpa [#allocation4], 0  ;;  %s1129_s0 = inlined_call_operand.vmem [shape: f32[3], index: 0, kind: input, shape index: {}]   ;;  %s1130_s1 = inlined_call_operand.vmem [shape: f32[3], index: 1, kind: input, shape index: {}]   ;;  %s1131_s2 = inlined_call_operand.vmem [shape: s32[4], index: 2, kind: input, shape index: {}]   ;;  %s1132_s3 = inlined_call_operand.vmem [shape: f32[2,3,32,128], index: 3, kind: input, shape index: {}]   ;;  %s1133_s4 = inlined_call_operand.hbm [shape: f32[2,3,32,128], index: 4, kind: output, shape index: {0}]   ;;  %s1134_s5 = inlined_call_operand.vmem [shape: s8[2,32,128], index: 5, kind: output, shape index: {1}]  }
   0x1   :  { %12 = vsyncpa [#allocation6], 0 }
   0x2   :  { %13 = vsyncpa [#allocation3], 0 }
   0x3   :  { %15 = vsyncpa [#allocation3 + $0x1], 0  ;;  %s877_s18 = smov 0   ;;  %s879_s19 = smov 0  }
   0x4   :  { %s881_s20 = smov 0   ;;  %s883_s21 = smov 0  }
   0x5   :  { %s885_s22 = smov 0   ;;  %s887_s23 = smov 0  }
   0x6 LB: > { %s578_s24 = sadd.s32 4294967295, %s838_s23   ;;  %s579_s25 = sadd.s32 4294967294, %s838_s23   ;;  %s838_s23 = sphi %s887_s23, %s21_s23   ;;  %s834_s22 = sphi %s885_s22, %s1156_s22   ;;  %s830_s21 = sphi %s883_s21, %s1155_s21   ;;  %s826_s20 = sphi %s881_s20, %s1154_s20   ;;  %s822_s19 = sphi %s879_s19, %s1153_s19   ;;  %s818_s18 = sphi %s877_s18, %s1152_s18  }
   0x7   : > { %s33_s26 = sadd.s32 1, %s834_s22  ;;  %s133_s27 = sadd.s32 1, %s826_s20 }
   0x8   : > { %p35_p0 = scmp.ge.s32.totalorder %s33_s26, 2  ;;  %p143_p1 = scmp.ne.s32.totalorder %s826_s20, %s822_s19 }
   0x9   : > { %p144_p2 = scmp.eq.s32.totalorder %s578_s24, 1  ;;  %p149_p3 = scmp.ne.s32.totalorder %s822_s19, %s818_s18 }
   0xa   : > { %s1158_s26 = smov (%p35_p0, %s33_s26), 0  ;;  %p150_p5 = scmp.eq.s32.totalorder %s579_s25, 1 }
   0xb   : > { %p917_p4 = por %p144_p2, %p143_p1  ;;  %s128_s29 = ssub.s32 %s834_s22, %s1158_s26 }
   0xc   : > { %p580_p6 = scmp.ge.s32.totalorder %s838_s23, 1  ;;  %p131_p7 = scmp.eq.s32.totalorder %s128_s29, 0 }
   0xd   : > { %s1139_s28 = scalar_select %p917_p4, 1, 0 }
   0xe   : > { %p924_p8 = por %p150_p5, %p149_p3  ;;  %p185_p9 = scmp.lt.s32.totalorder %s838_s23, 3 }
   0xf   : > { %s930_s6 = scalar_select %p131_p7, %s826_s20, %s133_s27  }
  0x10   : > { %s1140_s30 = scalar_select %p924_p8, 1, 0 }
  0x11   : > { %p932_p10 = pnand %p580_p6, %p185_p9  ;;  %p936_p11 = scmp.eq.s32.totalorder %s578_s24, 0 }
  0x12   : > { %s209_s11 = sshll.u32 %s1130_s1, 4  ;;  %s198_s14 = sshll.u32 %s1129_s0, 4  ;;  %s210_s11 = int_to_ptr.vmem [resolvable:$true] %s209_s11  ;;  %s199_s14 = int_to_ptr.vmem [resolvable:$true] %s198_s14 }
  0x13   : > { %s1141_s7 = scalar_select %p932_p10, 1, 0 }
  0x14   : > { %s1142_s8 = scalar_select %p936_p11, 1, 0 }
  0x15   : > { %p632_p12 = pneg %p932_p10  ;;  %s220_s24 = sshll.u32 %s1131_s2, 4  ;;  %s221_s24 = int_to_ptr.vmem [resolvable:$true] %s220_s24 }
  0x16   : > { %s707_s25 = scalar_lea.vmem %s210_s11, 16  ;;  %p715_p5 = scmp.lt.s32.totalorder %s210_s11, %s210_s11 }
  0x17   : > { %p950_p13 = pnand %p936_p11, %p632_p12  ;;  %p708_p0 = scmp.ne.s32.totalorder %s210_s11, %s707_s25 }
  0x18   : > { %p716_p6 = scmp.lt.s32.totalorder %s707_s25, %s707_s25 }
  0x19   : > { %p709_p1 = pneg %p950_p13 }
  0x1a   : > { %p717_p7 = por %p716_p6, %p715_p5 }
  0x1b   : > { %p710_p2 = pnand %p709_p1, %p708_p0 }
  0x1d   : > { %p711_p3 = pneg %p710_p2 }
  0x1f   : > { %p718_p9 = pnand %p717_p7, %p711_p3 }
  0x21   : > { %721 = shalt.err (!%p718_p9)
}
  0x22   : > { %s840_s27 = smov [#allocation5]   ;;  %s722_s29 = scalar_lea.vmem %s199_s14, 16 }
  0x23   : > { %638 = dma.vmem_to_smem (!%p950_p13), %s210_s11, 16, %s840_s27, [#allocation6]  }
  0x24   : > { %p723_p12 = scmp.ne.s32.totalorder %s199_s14, %s722_s29  ;;  %p730_p11 = scmp.lt.s32.totalorder %s199_s14, %s199_s14 }
  0x25   : > { %p731_p10 = scmp.lt.s32.totalorder %s722_s29, %s722_s29 }
  0x26   : > { %p725_p8 = pnand %p723_p12, %p709_p1 }
  0x27   : > { %p732_p0 = por %p731_p10, %p730_p11 }
  0x28   : > { %p726_p4 = pneg %p725_p8 }
  0x2a   : > { %p733_p2 = pnand %p732_p0, %p726_p4 }
  0x2c   : > { %736 = shalt.err (!%p733_p2)
}
  0x2d   : > { %s841_s9 = smov [#allocation2]   ;;  %s737_s10 = scalar_lea.vmem %s221_s24, 16 }
  0x2e   : > { %635 = dma.vmem_to_smem (!%p950_p13), %s199_s14, 16, %s841_s9, [#allocation4]  }
  0x2f   : > { %p738_p3 = scmp.ne.s32.totalorder %s221_s24, %s737_s10  ;;  %p745_p7 = scmp.lt.s32.totalorder %s221_s24, %s221_s24 }
  0x30   : > { %p746_p9 = scmp.lt.s32.totalorder %s737_s10, %s737_s10 }
  0x31   : > { %p740_p5 = pnand %p738_p3, %p709_p1 }
  0x32   : > { %p747_p8 = por %p746_p9, %p745_p7 }
  0x33   : > { %p741_p6 = pneg %p740_p5 }
  0x35   : > { %p748_p12 = pnand %p747_p8, %p741_p6 }
  0x37   : > { %751 = shalt.err (!%p748_p12)
}
  0x38   : > { %s842_s11 = smov [#allocation7]   ;;  %p1144_p4 = scmp.ne.s32.totalorder %s1141_s7, 0 }
  0x39   : > { %641 = dma.vmem_to_smem (!%p950_p13), %s221_s24, 16, %s842_s11, [#allocation6]  }
  0x3a   : > { %246 = sbr.rel (%p1144_p4) target bundleno = 111 (0x6f), region = 36  ;;  %p1145_p10 = scmp.ne.s32.totalorder (!%p1144_p4), %s1142_s8, 0 }
  0x41   : > { %805 = dma.done.wait (%p1145_p10), [#allocation4], 16  }
  0x42   : > { %807 = vsyncadd (%p1145_p10), [#allocation4], 4294967280 }
  0x43   : > { %809 = dma.done.wait (%p1145_p10), [#allocation6], 32  }
  0x44   : > { %811 = vsyncadd (%p1145_p10), [#allocation6], 4294967264 }
  0x45   : > { %260 = sfence }
  0x46   : > { %s282_s12 = sand.u32 1, %s822_s19   ;;  %p295_p11 = scmp.lt.s32.totalorder %s830_s21, 1  ;;  %v382_v0 = vlaneseq }
  0x47   : > { %s318_s7 = sld [smem:[#allocation2]]  ;;  %s991_s14 = smul.u32 96, %s282_s12 }
  0x48   : > { %s987_s13 = scalar_select %p295_p11, %s830_s21, 1  ;;  %v383_v15 = vshrl.u32 %v382_v0, 7  ;;  %v394_v23 = vand.u32 127, %v382_v0 }
  0x49   : > { %s324_s15 = sld [smem:[#allocation5]]  ;;  %s595_s17 = sld [smem:[#allocation2 + $0x1]] }
  0x4a   : > { %s616_s16 = smul.u32 96, %s987_s13  ;;  %s596_s8 = sld [smem:[#allocation5 + $0x1]]  ;;  %v1030_v33 = vadd.s32 8, %v383_v15  ;;  %v1032_v34 = vadd.s32 16, %v383_v15  ;;  %v386_v43 = vadd.s32 24, %v383_v15 }
  0x4b   : > { %s999_s29 = sld [smem:[#allocation2 + $0x2]]  ;;  %s611_s10 = sshll.u32 %s830_s21, 1 }
  0x4c   : > { %s997_s27 = scalar_lea.vmem %s1132_s3, %s616_s16  ;;  %s1004_s9 = sld [smem:[#allocation5 + $0x2]] }
  0x4d   : > { %v314_v1 = vld [vmem:[%s997_s27] sm:$0xff]  ;;  %v319_v2 = vstv %s318_s7  ;;  %v315_v3 = vld [vmem:[%s997_s27 + $0x8] sm:$0xff]  ;;  %v316_v4 = vld [vmem:[%s997_s27 + $0x10] sm:$0xff]  ;;  %s1012_s11 = sld [smem:[#allocation7 + %s611_s10]]  ;;  %s380_s7 = sadd.s32 1, %s611_s10 }
  0x4e   : > { %v320_v5 = vmul.f32 %v319_v2, %v314_v1  ;;  %v321_v6 = vmul.f32 %v319_v2, %v315_v3  ;;  %v322_v7 = vmul.f32 %v319_v2, %v316_v4  ;;  %v317_v8 = vld [vmem:[%s997_s27 + $0x18] sm:$0xff]  ;;  %v591_v9 = vld [vmem:[%s997_s27 + $0x20] sm:$0xff]  ;;  %v592_v12 = vld [vmem:[%s997_s27 + $0x28] sm:$0xff]  ;;  %s1014_s16 = sld [smem:[#allocation7 + %s380_s7]]  ;;  %s1066_s25 = scalar_lea.sflag [#allocation3], %s282_s12 }
  0x4f   : > { %v325_v10 = vstv %s324_s15  ;;  %v323_v11 = vmul.f32 %v319_v2, %v317_v8  ;;  %v593_v13 = vld [vmem:[%s997_s27 + $0x30] sm:$0xff]  ;;  %v594_v14 = vld [vmem:[%s997_s27 + $0x38] sm:$0xff]  ;;  %v340_v20 = vstv %s595_s17  ;;  %s1018_s15 = scalar_lea.vmem [#allocation8], %s991_s14  ;;  %s617_s17 = smul.u32 1536, %s830_s21 }
  0x50   : > { %v326_v16 = vadd.f32 %v325_v10, %v320_v5  ;;  %v327_v17 = vadd.f32 %v325_v10, %v321_v6  ;;  %v328_v18 = vadd.f32 %v325_v10, %v322_v7  ;;  %v346_v21 = vstv %s596_s8  ;;  %v601_v22 = vld [vmem:[%s997_s27 + $0x40] sm:$0xff]  ;;  %v602_v28 = vld [vmem:[%s997_s27 + $0x48] sm:$0xff]  ;;  %v603_v29 = vld [vmem:[%s997_s27 + $0x50] sm:$0xff]  ;;  %s434_s14 = sshll.u32 %s1018_s15, 4  ;;  %p1150_p1 = scmp.ne.s32.totalorder %s1139_s28, 0  ;;  %s1046_s14 = int_to_ptr.vmem [resolvable:$true] %s434_s14 }
  0x51   : > { %v329_v19 = vadd.f32 %v325_v10, %v323_v11  ;;  %v341_v24 = vmul.f32 %v591_v9, %v340_v20  ;;  %v342_v25 = vmul.f32 %v592_v12, %v340_v20  ;;  %v343_v26 = vmul.f32 %v593_v13, %v340_v20  ;;  %v604_v30 = vld [vmem:[%s997_s27 + $0x58] sm:$0xff]  ;;  %s1044_s24 = scalar_lea.hbm %s1133_s4, %s617_s17  ;;  %s752_s27 = scalar_lea.vmem %s1046_s14, 1536 }
  0x52   : > { %330 = vst [vmem:[%s1018_s15] sm:$0xff] %v326_v16  ;;  %331 = vst [vmem:[%s1018_s15 + $0x8] sm:$0xff] %v327_v17  ;;  %v344_v27 = vmul.f32 %v594_v14, %v340_v20  ;;  %v362_v31 = vstv %s999_s29  ;;  %v368_v32 = vstv %s1004_s9  ;;  %p753_p13 = scmp.ne.s32.totalorder %s1046_s14, %s752_s27  ;;  %s843_s29 = smov [#allocation8]  }
  0x53   : > { %332 = vst [vmem:[%s1018_s15 + $0x10] sm:$0xff] %v328_v18  ;;  %333 = vst [vmem:[%s1018_s15 + $0x18] sm:$0xff] %v329_v19  ;;  %v347_v35 = vadd.f32 %v346_v21, %v341_v24  ;;  %v348_v36 = vadd.f32 %v346_v21, %v342_v25  ;;  %v349_v37 = vadd.f32 %v346_v21, %v343_v26  ;;  %v395_v44 = vstv %s1012_s11  ;;  %s756_s9 = sshll.u32 %s843_s29, 4  ;;  %s757_s9 = int_to_ptr.vmem [resolvable:$false] %s756_s9 }
  0x54   : > { %v350_v38 = vadd.f32 %v346_v21, %v344_v27  ;;  %v363_v39 = vmul.f32 %v601_v22, %v362_v31  ;;  %v364_v40 = vmul.f32 %v602_v28, %v362_v31  ;;  %v365_v41 = vmul.f32 %v603_v29, %v362_v31  ;;  %p754_p0 = pnand %p753_p13, %p1150_p1  ;;  %s758_s10 = scalar_lea.vmem %s757_s9, 3072 }
  0x55   : > { %v366_v42 = vmul.f32 %v604_v30, %v362_v31  ;;  %597 = vst [vmem:[%s1018_s15 + $0x20] sm:$0xff] %v347_v35  ;;  %598 = vst [vmem:[%s1018_s15 + $0x28] sm:$0xff] %v348_v36  ;;  %v400_v45 = vstv %s1014_s16  ;;  %vm396_vm0 = vcmp.ge.s32.totalorder %v383_v15, %v395_v44  ;;  %vm397_vm1 = vcmp.ge.s32.totalorder %v1030_v33, %v395_v44  ;;  %p759_p3 = scmp.lt.s32.totalorder %s1046_s14, %s757_s9  ;;  %p760_p5 = scmp.lt.s32.totalorder %s758_s10, %s752_s27 }
  0x56   : > { %599 = vst [vmem:[%s1018_s15 + $0x30] sm:$0xff] %v349_v37  ;;  %600 = vst [vmem:[%s1018_s15 + $0x38] sm:$0xff] %v350_v38  ;;  %v369_v46 = vadd.f32 %v368_v32, %v363_v39  ;;  %v370_v47 = vadd.f32 %v368_v32, %v364_v40  ;;  %v371_v48 = vadd.f32 %v368_v32, %v365_v41  ;;  %p755_p2 = pneg %p754_p0 }
  0x57   : > { %v372_v49 = vadd.f32 %v368_v32, %v366_v42  ;;  %vm398_vm2 = vcmp.ge.s32.totalorder %v1032_v34, %v395_v44  ;;  %vm1054_vm3 = vcmp.ge.s32.totalorder %v394_v23, %v400_v45  ;;  %vm399_vm4 = vcmp.ge.s32.totalorder %v386_v43, %v395_v44  ;;  %p761_p6 = por %p760_p5, %p759_p3 }
  0x58   : > { %607 = vst [vmem:[%s1018_s15 + $0x40] sm:$0xff] %v369_v46  ;;  %608 = vst [vmem:[%s1018_s15 + $0x48] sm:$0xff] %v370_v47 }
  0x59   : > { %609 = vst [vmem:[%s1018_s15 + $0x50] sm:$0xff] %v371_v48  ;;  %610 = vst [vmem:[%s1018_s15 + $0x58] sm:$0xff] %v372_v49  ;;  %p762_p7 = pnand %p761_p6, %p755_p2 }
  0x5a   : > { %vm1060_vm5 = vmor %vm396_vm0, %vm1054_vm3 }
  0x5b   : > { %765 = shalt.err (!%p762_p7)
}
  0x5c   : > { %s766_s12 = scalar_lea.hbm %s1044_s24, 1536  ;;  %s770_s16 = scalar_lea.hbm %s1133_s4, 3072 }
  0x5d   : > { %p767_p9 = scmp.ne.s32.totalorder %s1044_s24, %s766_s12  ;;  %p771_p4 = scmp.lt.u32.totalorder %s1044_s24, %s1133_s4 }
  0x5e   : > { %p772_p10 = scmp.lt.u32.totalorder %s770_s16, %s766_s12  ;;  %p774_p13 = scmp.lt.u32.totalorder %s766_s12, %s1044_s24 }
  0x5f   : > { %p768_p8 = pnand %p767_p9, %p1150_p1 }
  0x60   : > { %p773_p11 = por %p772_p10, %p771_p4 }
  0x61   : > { %p769_p12 = pneg %p768_p8 }
  0x62   : > { %p775_p0 = por %p774_p13, %p773_p11 }
  0x64   : > { %p776_p2 = pnand %p775_p0, %p769_p12 }
  0x66   : > { %779 = shalt.err (!%p776_p2)
}
  0x67   : > { %s844_s21 = smov 128   ;;  %s845_s8 = smov 8   ;;  %vm403_vm6 = vmor %vm397_vm1, %vm1054_vm3  ;;  %v846_v52 = vmov 0  }
  0x68   : > { %630 = dma.vmem_to_hbm [thread:$0]  (%p1150_p1), %s1046_s14, 1536, %s1044_s24, %s1066_s25, %s844_s21, %s844_s21, %s845_s8   ;;  %vm404_vm7 = vmor %vm398_vm2, %vm1054_vm3 }
  0x69   : > { %s590_s27 = sshll.u32 %s987_s13, 3  ;;  %vm405_vm8 = vmor %vm399_vm4, %vm1054_vm3 }
  0x6a   : > { %vm406_vm9 = vmpackc.low %vm403_vm6, %vm1060_vm5  ;;  %s311_s24 = scalar_lea.vmem %s1134_s5, %s590_s27 }
  0x6b   : > { %vm407_vm10 = vmpackc.low %vm405_vm8, %vm404_vm7 }
  0x6c   : > { %vm408_vm11 = vmpackc.even %vm407_vm10, %vm406_vm9 }
  0x6d   : > { %v409_v53 = vsel %vm408_vm11, 16843009, %v846_v52 }
  0x6e   : > { %410 = vst [vmem:[%s311_s24] sm:$0xff] %v409_v53 }
  0x6f PF: > { %p652_p1 = scmp.ge.s32.totalorder %s838_s23, 2  ;;  %s452_s13 = sand.u32 1, %s818_s18  }
  0x70   : > { %p1151_p3 = scmp.ne.s32.totalorder %s1140_s30, 0  ;;  %s453_s25 = scalar_lea.sflag [#allocation3], %s452_s13 }
  0x72   : > { %p643_p5 = pnand %p652_p1, %p1151_p3 }
  0x74   : > { %813 = dma.done.wait (!%p643_p5), %s453_s25, 1536  }
  0x75   : > { %815 = vsyncadd (!%p643_p5), %s453_s25, 4294965760  ;;  %s21_s23 = sadd.s32 1, %s838_s23   ;;  %s1152_s18 = smov %s822_s19 }
  0x76   : > { %p18_p6 = scmp.ge.s32.totalorder %s21_s23, 4   ;;  %s1153_s19 = smov %s826_s20 }
  0x77   : > { %s1154_s20 = smov %s930_s6  ;;  %s1155_s21 = smov %s834_s22 }
  0x78   : > { %s1156_s22 = smov %s1158_s26  ;;  %20 = sbr.rel (!%p18_p6) target bundleno = 6 (0x6), region = 100 }
  0x7f   :  { %468 = vsyncpa [#allocation3], 1 }
  0x80   :  { %470 = vsyncpa [#allocation3 + $0x1], 1 }
  0x81   :  { %471 = vsyncpa [#allocation4], 1 }
  0x82   :  { %473 = vsyncpa [#allocation4 + $0x1], 1 }
  0x83   :  { %474 = vsyncpa [#allocation6], 1 }

</bundles_post_ra>
